<compile_context>
chip_gen: v7x
topology: tpu7x:2x2x1
jax: 0.10.0
libtpu: 0.0.40
codegen_flags: <defaults>
</compile_context>

<pallas_src>
import functools

import jax
import jax.numpy as jnp
from jax.experimental import pallas as pl
from jax.experimental.pallas import tpu as pltpu

# ----- static problem configuration -----------------------------------------
EMBED_SIZE = 32          # F : output word-embedding size
CHAR_EMBED = 50          # C : character embedding size (fixed in the module)
KERNEL_K = 5             # k : Conv1d kernel width (standard char-CNN)
VOCAB_CHARS = 30         # |char vocab|
PAD_IDX = 0              # vocab.char2id['<pad>']

SRC_LEN = 8
BATCH = 2
MAX_WORD_LEN = 16        # L (must be >= KERNEL_K)

# Max words per grid step.  Sized so the in-kernel one-hot / im2col
# intermediates (~tens of KB per word after vreg padding) stay well inside the
# default scoped-VMEM budget while still amortizing the ~0.35 us per-step cost.
MAX_TN = 128


def _embeddings_kernel(ids_ref, wfold_ref, cb_ref, hww_ref, hwb_ref, out_ref,
                       *, L, K, V, F):
    """Fused char-gather + Conv1d (one matmul) -> ReLU -> max-over-time -> Highway."""
    ids = ids_ref[...]                           # (TN, L, 1) int32
    tn = ids.shape[0]
    l_out = L - K + 1

    # --- one-hot im2col (fuses the character-embedding lookup) --------------
    #   x[n, t, tau*V + v] = (ids[n, t + tau] == v)
    viota = jax.lax.broadcasted_iota(jnp.int32, (tn, l_out, V), 2)
    pieces = []
    for tau in range(K):                         # static unrolled loop, K = 5
        ids_sh = ids[:, tau:tau + l_out, :]      # (TN, l_out, 1) -> lane broadcast
        pieces.append((ids_sh == viota).astype(jnp.float32))
    x = jnp.concatenate(pieces, axis=-1)         # (TN, l_out, K*V) = (.., 150)

    # --- Conv1d as a single MXU contraction over K*V -------------------------
    conv = jax.lax.dot_general(
        x, wfold_ref[...],
        dimension_numbers=(((2,), (0,)), ((), ())),
        preferred_element_type=jnp.float32)      # (TN, l_out, F)
    conv = conv + cb_ref[...][None, :, :]        # bias (1, F) -> broadcast

    # ReLU + max-pool over the time dimension.
    conv_out = jnp.max(jnp.maximum(conv, 0.0), axis=1)          # (TN, F)

    # --- Highway: one fused (F, 2F) matmul, split into proj / gate ----------
    y = jnp.dot(conv_out, hww_ref[...],
                preferred_element_type=jnp.float32) + hwb_ref[...]   # (TN, 2F)
    proj = jnp.maximum(y[:, :F], 0.0)
    gate = jax.nn.sigmoid(y[:, F:])
    out_ref[...] = conv_out + gate * (proj - conv_out)


def _choose_word_tile(n):
    """Large word tile, multiple of 8, but keep >= 2 grid steps (v7x: 2 TCs)."""
    half = pl.cdiv(n, 2)
    tn = min(MAX_TN, ((half + 7) // 8) * 8)
    return max(tn, 8)


def model_embeddings_forward(input_ids, params):
    """input_ids: (src_len, batch, max_word_len) int32 -> (src_len, batch, F) f32."""
    src_len, b, L = input_ids.shape
    F, K, V = EMBED_SIZE, KERNEL_K, VOCAB_CHARS
    N = src_len * b

    # --- wrapper-side weight preprocessing (done once, tiny) ----------------
    # Fold the char-embedding table into the conv weights:
    #   wfold[tau*V + v, f] = sum_c char_embed[v, c] * conv_w[tau, c, f]
    # (padding row of char_embed is zero, so <pad> chars contribute nothing.)
    wfold = jnp.einsum("vc,kcf->kvf", params["char_embed"], params["conv_w"],
                       precision=jax.lax.Precision.HIGHEST).reshape(K * V, F)
    hw_w = jnp.concatenate([params["proj_w"], params["gate_w"]], axis=1)  # (F, 2F)
    hw_b = jnp.concatenate([params["proj_b"], params["gate_b"]], axis=1)  # (1, 2F)

    # --- word tiling + padding ----------------------------------------------
    TN = _choose_word_tile(N)
    n_blocks = pl.cdiv(N, TN)
    n_pad = n_blocks * TN

    ids = input_ids.reshape(N, L).astype(jnp.int32)
    if n_pad != N:
        ids = jnp.pad(ids, ((0, n_pad - N), (0, 0)), constant_values=PAD_IDX)
    # Trailing unit dim so the in-kernel one-hot compare is a pure lane broadcast.
    ids = ids.reshape(n_pad, L, 1)

    kernel = functools.partial(_embeddings_kernel, L=L, K=K, V=V, F=F)

    out = pl.pallas_call(
        kernel,
        out_shape=jax.ShapeDtypeStruct((n_pad, F), jnp.float32),
        grid_spec=pltpu.PrefetchScalarGridSpec(
            num_scalar_prefetch=0,
            grid=(n_blocks,),
            in_specs=[
                pl.BlockSpec((TN, L, 1), lambda i: (i, 0, 0)),   # char ids
                pl.BlockSpec((K * V, F), lambda i: (0, 0)),      # folded conv weights
                pl.BlockSpec((1, F), lambda i: (0, 0)),          # conv bias
                pl.BlockSpec((F, 2 * F), lambda i: (0, 0)),      # fused highway W
                pl.BlockSpec((1, 2 * F), lambda i: (0, 0)),      # fused highway b
            ],
            out_specs=pl.BlockSpec((TN, F), lambda i: (i, 0)),
        ),
        compiler_params=pltpu.CompilerParams(
            dimension_semantics=("parallel",)),
    )(ids, wfold, params["conv_b"], hw_w, hw_b)

    return out[:N].reshape(src_len, b, F)


def reference_forward(input_ids, params):
    """Pure-JAX reference mirroring the original module (for correctness checks)."""
    S, B, L = input_ids.shape
    F, K = EMBED_SIZE, KERNEL_K
    emb = params["char_embed"][input_ids].reshape(S * B, L, CHAR_EMBED)
    l_out = L - K + 1
    conv = jnp.zeros((S * B, l_out, F), jnp.float32)
    for tau in range(K):
        conv = conv + jnp.einsum("nlc,cf->nlf",
                                 emb[:, tau:tau + l_out, :],
                                 params["conv_w"][tau],
                                 precision=jax.lax.Precision.HIGHEST)
    conv = conv + params["conv_b"]
    conv_out = jnp.max(jax.nn.relu(conv), axis=1)
    proj = jax.nn.relu(conv_out @ params["proj_w"] + params["proj_b"])
    gate = jax.nn.sigmoid(conv_out @ params["gate_w"] + params["gate_b"])
    hw = gate * proj + (1.0 - gate) * conv_out
    return hw.reshape(S, B, F)


def init_params(key):
    ks = jax.random.split(key, 7)
    F, C, K = EMBED_SIZE, CHAR_EMBED, KERNEL_K
    char_embed = jax.random.normal(ks[0], (VOCAB_CHARS, C), jnp.float32) * 0.1
    char_embed = char_embed.at[PAD_IDX].set(0.0)        # padding_idx row is zero
    return {
        "char_embed": char_embed,
        "conv_w": jax.random.normal(ks[1], (K, C, F), jnp.float32) * 0.1,
        "conv_b": jax.random.normal(ks[2], (1, F), jnp.float32) * 0.1,
        "proj_w": jax.random.normal(ks[3], (F, F), jnp.float32) * 0.1,
        "proj_b": jax.random.normal(ks[4], (1, F), jnp.float32) * 0.1,
        "gate_w": jax.random.normal(ks[5], (F, F), jnp.float32) * 0.1,
        "gate_b": jax.random.normal(ks[6], (1, F), jnp.float32) * 0.1,
    }


if __name__ == "__main__":
    key = jax.random.PRNGKey(0)
    k_param, k_ids = jax.random.split(key)
    params = init_params(k_param)

    input_ids = jax.random.randint(
        k_ids, (SRC_LEN, BATCH, MAX_WORD_LEN), 0, VOCAB_CHARS, dtype=jnp.int32)

    out = model_embeddings_forward(input_ids, params)
    out = jax.block_until_ready(out)

    ref = reference_forward(input_ids, params)
    assert out.shape == (SRC_LEN, BATCH, EMBED_SIZE)
    assert jnp.allclose(out, ref, atol=1e-4, rtol=1e-4)
    print("KERNEL_OK")
</pallas_src>

<mosaic_0001>
module attributes {stable_mosaic.version = 11 : i64} {
  func.func @_embeddings_kernel(%arg0: i32, %arg1: memref<8x16x1xi32, #tpu.memory_space<vmem>>, %arg2: memref<150x32xf32, #tpu.memory_space<vmem>>, %arg3: memref<1x32xf32, #tpu.memory_space<vmem>>, %arg4: memref<32x64xf32, #tpu.memory_space<vmem>>, %arg5: memref<1x64xf32, #tpu.memory_space<vmem>>, %arg6: memref<8x32xf32, #tpu.memory_space<vmem>>) attributes {dimension_semantics = [#tpu.dimension_semantics<parallel>], iteration_bounds = array<i64: 2>, scalar_prefetch = 0 : i64, scratch_operands = 0 : i64, tpu.core_type = #tpu.core_type<tc>, window_params = [{transform_indices = @transform_0, window_bounds = array<i64: 8, 16, 1>}, {pipeline_mode = #tpu.pipeline_mode<synchronous>, transform_indices = @transform_1, window_bounds = array<i64: 150, 32>}, {pipeline_mode = #tpu.pipeline_mode<synchronous>, transform_indices = @transform_2, window_bounds = array<i64: 1, 32>}, {pipeline_mode = #tpu.pipeline_mode<synchronous>, transform_indices = @transform_3, window_bounds = array<i64: 32, 64>}, {pipeline_mode = #tpu.pipeline_mode<synchronous>, transform_indices = @transform_4, window_bounds = array<i64: 1, 64>}, {transform_indices = @transform_5, window_bounds = array<i64: 8, 32>}]} {
    %c0 = arith.constant 0 : index
    %c0_0 = arith.constant 0 : index
    %c0_1 = arith.constant 0 : index
    %0 = vector.load %arg1[%c0, %c0_0, %c0_1] : memref<8x16x1xi32, #tpu.memory_space<vmem>>, vector<8x16x1xi32>
    %1 = tpu.iota {dimensions = array<i32: 2>} : vector<8x12x30xi32>
    %2 = vector.extract_strided_slice %0 {offsets = [0, 0, 0], sizes = [8, 12, 1], strides = [1, 1, 1]} : vector<8x16x1xi32> to vector<8x12x1xi32>
    %3 = vector.broadcast %2 : vector<8x12x1xi32> to vector<8x12x30xi32>
    %4 = arith.cmpi eq, %3, %1 : vector<8x12x30xi32>
    %5 = arith.extui %4 : vector<8x12x30xi1> to vector<8x12x30xi32>
    %6 = arith.sitofp %5 : vector<8x12x30xi32> to vector<8x12x30xf32>
    %7 = vector.extract_strided_slice %0 {offsets = [0, 1, 0], sizes = [8, 12, 1], strides = [1, 1, 1]} : vector<8x16x1xi32> to vector<8x12x1xi32>
    %8 = vector.broadcast %7 : vector<8x12x1xi32> to vector<8x12x30xi32>
    %9 = arith.cmpi eq, %8, %1 : vector<8x12x30xi32>
    %10 = arith.extui %9 : vector<8x12x30xi1> to vector<8x12x30xi32>
    %11 = arith.sitofp %10 : vector<8x12x30xi32> to vector<8x12x30xf32>
    %12 = vector.extract_strided_slice %0 {offsets = [0, 2, 0], sizes = [8, 12, 1], strides = [1, 1, 1]} : vector<8x16x1xi32> to vector<8x12x1xi32>
    %13 = vector.broadcast %12 : vector<8x12x1xi32> to vector<8x12x30xi32>
    %14 = arith.cmpi eq, %13, %1 : vector<8x12x30xi32>
    %15 = arith.extui %14 : vector<8x12x30xi1> to vector<8x12x30xi32>
    %16 = arith.sitofp %15 : vector<8x12x30xi32> to vector<8x12x30xf32>
    %17 = vector.extract_strided_slice %0 {offsets = [0, 3, 0], sizes = [8, 12, 1], strides = [1, 1, 1]} : vector<8x16x1xi32> to vector<8x12x1xi32>
    %18 = vector.broadcast %17 : vector<8x12x1xi32> to vector<8x12x30xi32>
    %19 = arith.cmpi eq, %18, %1 : vector<8x12x30xi32>
    %20 = arith.extui %19 : vector<8x12x30xi1> to vector<8x12x30xi32>
    %21 = arith.sitofp %20 : vector<8x12x30xi32> to vector<8x12x30xf32>
    %22 = vector.extract_strided_slice %0 {offsets = [0, 4, 0], sizes = [8, 12, 1], strides = [1, 1, 1]} : vector<8x16x1xi32> to vector<8x12x1xi32>
    %23 = vector.broadcast %22 : vector<8x12x1xi32> to vector<8x12x30xi32>
    %24 = arith.cmpi eq, %23, %1 : vector<8x12x30xi32>
    %25 = arith.extui %24 : vector<8x12x30xi1> to vector<8x12x30xi32>
    %26 = arith.sitofp %25 : vector<8x12x30xi32> to vector<8x12x30xf32>
    %27 = tpu.concatenate %6, %11, %16, %21, %26 in 2 : vector<8x12x30xf32>, vector<8x12x30xf32>, vector<8x12x30xf32>, vector<8x12x30xf32>, vector<8x12x30xf32> -> vector<8x12x150xf32>
    %c0_2 = arith.constant 0 : index
    %c0_3 = arith.constant 0 : index
    %28 = vector.load %arg2[%c0_2, %c0_3] : memref<150x32xf32, #tpu.memory_space<vmem>>, vector<150x32xf32>
    %cst = arith.constant dense<0.000000e+00> : vector<8x12x32xf32>
    %29 = tpu.matmul %27, %28, %cst {dimension_numbers = #tpu.dot_dimension_numbers<[2], [0], [0, 1], [1], [0, 0, 0, 1, 1, 1], [], []>} : vector<8x12x150xf32>, vector<150x32xf32>, vector<8x12x32xf32> -> vector<8x12x32xf32>
    %c0_4 = arith.constant 0 : index
    %c0_5 = arith.constant 0 : index
    %30 = vector.load %arg3[%c0_4, %c0_5] : memref<1x32xf32, #tpu.memory_space<vmem>>, vector<1x32xf32>
    %31 = vector.shape_cast %30 : vector<1x32xf32> to vector<1x1x32xf32>
    %32 = vector.broadcast %31 : vector<1x1x32xf32> to vector<8x12x32xf32>
    %33 = arith.addf %29, %32 : vector<8x12x32xf32>
    %cst_6 = arith.constant 0.000000e+00 : f32
    %34 = vector.broadcast %cst_6 : f32 to vector<8x12x32xf32>
    %35 = arith.maximumf %33, %34 : vector<8x12x32xf32>
    %cst_7 = arith.constant dense<0xFF800000> : vector<8x32xf32>
    %36 = vector.multi_reduction <maximumf>, %35, %cst_7 [1] : vector<8x12x32xf32> to vector<8x32xf32>
    %c0_8 = arith.constant 0 : index
    %c0_9 = arith.constant 0 : index
    %37 = vector.load %arg4[%c0_8, %c0_9] : memref<32x64xf32, #tpu.memory_space<vmem>>, vector<32x64xf32>
    %cst_10 = arith.constant dense<0.000000e+00> : vector<8x64xf32>
    %38 = tpu.matmul %36, %37, %cst_10 {dimension_numbers = #tpu.dot_dimension_numbers<[1], [0], [0], [1], [0, 0, 1, 1], [], []>} : vector<8x32xf32>, vector<32x64xf32>, vector<8x64xf32> -> vector<8x64xf32>
    %c0_11 = arith.constant 0 : index
    %c0_12 = arith.constant 0 : index
    %39 = vector.load %arg5[%c0_11, %c0_12] : memref<1x64xf32, #tpu.memory_space<vmem>>, vector<1x64xf32>
    %40 = vector.broadcast %39 : vector<1x64xf32> to vector<8x64xf32>
    %41 = arith.addf %38, %40 : vector<8x64xf32>
    %42 = vector.extract_strided_slice %41 {offsets = [0, 0], sizes = [8, 32], strides = [1, 1]} : vector<8x64xf32> to vector<8x32xf32>
    %cst_13 = arith.constant 0.000000e+00 : f32
    %43 = vector.broadcast %cst_13 : f32 to vector<8x32xf32>
    %44 = arith.maximumf %42, %43 : vector<8x32xf32>
    %45 = vector.extract_strided_slice %41 {offsets = [0, 32], sizes = [8, 32], strides = [1, 1]} : vector<8x64xf32> to vector<8x32xf32>
    %46 = arith.negf %45 : vector<8x32xf32>
    %47 = math.exp %46 : vector<8x32xf32>
    %cst_14 = arith.constant 1.000000e+00 : f32
    %48 = vector.broadcast %cst_14 : f32 to vector<8x32xf32>
    %49 = arith.addf %48, %47 : vector<8x32xf32>
    %50 = arith.divf %48, %49 : vector<8x32xf32>
    %51 = arith.subf %44, %36 : vector<8x32xf32>
    %52 = arith.mulf %50, %51 : vector<8x32xf32>
    %53 = arith.addf %36, %52 : vector<8x32xf32>
    %c0_15 = arith.constant 0 : index
    %c0_16 = arith.constant 0 : index
    %54 = vector.load %arg6[%c0_15, %c0_16] : memref<8x32xf32, #tpu.memory_space<vmem>>, vector<8x32xf32>
    tpu.vector_store %arg6[%c0_15, %c0_16], %53 {strides = array<i32>} : memref<8x32xf32, #tpu.memory_space<vmem>>, vector<8x32xf32>,
    return
  }
  func.func @transform_0(%arg0: i32) -> (i32, i32, i32) {
    %c0_i32 = arith.constant 0 : i32
    %c0_i32_0 = arith.constant 0 : i32
    %c0_i32_1 = arith.constant 0 : i32
    return %arg0, %c0_i32, %c0_i32_0 : i32, i32, i32
  }
  func.func @transform_1(%arg0: i32) -> (i32, i32) {
    %c0_i32 = arith.constant 0 : i32
    %c0_i32_0 = arith.constant 0 : i32
    %c0_i32_1 = arith.constant 0 : i32
    return %c0_i32, %c0_i32_0 : i32, i32
  }
  func.func @transform_2(%arg0: i32) -> (i32, i32) {
    %c0_i32 = arith.constant 0 : i32
    %c0_i32_0 = arith.constant 0 : i32
    %c0_i32_1 = arith.constant 0 : i32
    return %c0_i32, %c0_i32_0 : i32, i32
  }
  func.func @transform_3(%arg0: i32) -> (i32, i32) {
    %c0_i32 = arith.constant 0 : i32
    %c0_i32_0 = arith.constant 0 : i32
    %c0_i32_1 = arith.constant 0 : i32
    return %c0_i32, %c0_i32_0 : i32, i32
  }
  func.func @transform_4(%arg0: i32) -> (i32, i32) {
    %c0_i32 = arith.constant 0 : i32
    %c0_i32_0 = arith.constant 0 : i32
    %c0_i32_1 = arith.constant 0 : i32
    return %c0_i32, %c0_i32_0 : i32, i32
  }
  func.func @transform_5(%arg0: i32) -> (i32, i32) {
    %c0_i32 = arith.constant 0 : i32
    %c0_i32_0 = arith.constant 0 : i32
    return %arg0, %c0_i32 : i32, i32
  }
}

</mosaic_0001>

<bundles_post_ra>
// kernel: tpu_custom_call.1
= control target key start
LH: loop header
LB: loop body
LE: loop exit
PB: predicated region body
PF: predicated region fallthrough
CT: control target
= control target key end

     0   :  { %10 = vsyncpa [#allocation3], 0  ;;  %s2452_s0 = inlined_call_operand.vmem [shape: s32[16,16,1], index: 0, kind: input, shape index: {}]   ;;  %s2453_s1 = inlined_call_operand.vmem [shape: f32[150,32], index: 1, kind: input, shape index: {}]   ;;  %s2454_s2 = inlined_call_operand.vmem [shape: f32[1,32], index: 2, kind: input, shape index: {}]   ;;  %s2455_s3 = inlined_call_operand.vmem [shape: f32[32,64], index: 3, kind: input, shape index: {}]   ;;  %s2456_s4 = inlined_call_operand.vmem [shape: f32[1,64], index: 4, kind: input, shape index: {}]   ;;  %s2457_s5 = inlined_call_operand.hbm [shape: f32[16,32], index: 5, kind: output, shape index: {}]  }
   0x1   :  { %12 = vsyncpa [#allocation3 + $0x1], 0  ;;  %s1852_s18 = smov 0   ;;  %s1854_s19 = smov 0  }
   0x2   :  { %s1856_s20 = smov 0   ;;  %s1858_s21 = smov 0  }
   0x3 LB: > { %s1873_s22 = sadd.s32 4294967295, %s1809_s21   ;;  %s1401_s23 = sadd.s32 4294967294, %s1809_s21   ;;  %s1809_s21 = sphi %s1858_s21, %s2463_s21   ;;  %s1805_s20 = sphi %s1856_s20, %s2462_s20   ;;  %s1801_s19 = sphi %s1854_s19, %s2461_s19   ;;  %s1797_s18 = sphi %s1852_s18, %s2460_s18  }
   0x4   : > { %s1877_s24 = sadd.s32 1, %s1809_s21   ;;  %s135_s25 = sadd.s32 1, %s1805_s20 }
   0x5   : > { %s132_s26 = ssub.s32 %s1809_s21, %s1877_s24  ;;  %p145_p0 = scmp.ne.s32.totalorder %s1805_s20, %s1801_s19 }
   0x6   : > { %p133_p1 = scmp.eq.s32.totalorder %s132_s26, 0  ;;  %p146_p2 = scmp.eq.s32.totalorder %s1873_s22, 1 }
   0x7   : > { %p151_p3 = scmp.ne.s32.totalorder %s1801_s19, %s1797_s18  ;;  %p152_p4 = scmp.eq.s32.totalorder %s1401_s23, 1 }
   0x8   : > { %s1888_s27 = scalar_select %p133_p1, %s1805_s20, %s135_s25  }
   0x9   : > { %p1890_p5 = por %p146_p2, %p145_p0  ;;  %p1894_p6 = por %p152_p4, %p151_p3 }
   0xa   : > { %p1404_p7 = scmp.ge.s32.totalorder %s1809_s21, 1  ;;  %p192_p8 = scmp.lt.s32.totalorder %s1809_s21, 3 }
   0xc   : > { %p193_p9 = pnand %p1404_p7, %p192_p8 }
   0xd   : > { %s1406_s30 = sshll.u32 (!%p193_p9), %s1873_s22, 3  ;;  %v1811_v0 = vmov (!%p193_p9), 0   ;;  %v718_v17 = vld [vmem:[%s2453_s1] sm:$0xff] (!%p193_p9)  ;;  %v719_v18 = vld [vmem:[%s2453_s1 + $0x8] sm:$0xff] (!%p193_p9)  ;;  %v720_v19 = vld [vmem:[%s2453_s1 + $0x10] sm:$0xff] (!%p193_p9)  ;;  %v1812_v20 = vmov (!%p193_p9), 0.0|0.0   ;;  %v244_v39 = vlaneseq (!%p193_p9) }
   0xe   : > { %196 = sbr.rel (%p193_p9) target bundleno = 1066 (0x42a), region = 40  ;;  %1582 = vset.pattern.permute.xlu1 (!%p193_p9), %v1811_v0  ;;  %1581 = vset.pattern.permute.xlu0 (!%p193_p9), %v1811_v0  ;;  %p222_p10 = scmp.lt.s32.totalorder (!%p193_p9), %s1406_s30, 15  ;;  %v1480_v21 = vpack.c.bf16 (!%p193_p9), %v719_v18, %v718_v17  ;;  %v721_v22 = vld [vmem:[%s2453_s1 + $0x18] sm:$0xff] (!%p193_p9)  ;;  %v722_v24 = vld [vmem:[%s2453_s1 + $0x20] sm:$0xff] (!%p193_p9)  ;;  %v723_v25 = vld [vmem:[%s2453_s1 + $0x28] sm:$0xff] (!%p193_p9)  ;;  %v1813_v46 = vmov (!%p193_p9), 0.0  }
   0xf   : > { %1479 = vmatprep.subr.bf16.mxu0 (!%p193_p9), %v1812_v20  ;;  %1512 = vmatprep.subr.bf16.mxu1 (!%p193_p9), %v1812_v20  ;;  %v1483_v23 = vpack.c.bf16 (!%p193_p9), %v721_v22, %v720_v19  ;;  %v1486_v26 = vpack.c.bf16 (!%p193_p9), %v723_v25, %v722_v24  ;;  %v724_v27 = vld [vmem:[%s2453_s1 + $0x30] sm:$0xff] (!%p193_p9)  ;;  %v725_v28 = vld [vmem:[%s2453_s1 + $0x38] sm:$0xff] (!%p193_p9)  ;;  %v726_v30 = vld [vmem:[%s2453_s1 + $0x40] sm:$0xff] (!%p193_p9)  ;;  %v1962_v40 = vand.u32 (!%p193_p9), 127, %v244_v39  ;;  %vm431_vm4 = vcmask (!%p193_p9), 1045504   ;;  %s1814_s16 = smov (!%p193_p9), 60  }
  0x10   : > { %1481 = vmatpush1.bf16.msra.mxu0 (!%p193_p9), %v1480_v21  ;;  %1522 = vmatpush1.bf16.msra.mxu1 (!%p193_p9), %v1480_v21  ;;  %v1489_v29 = vpack.c.bf16 (!%p193_p9), %v725_v28, %v724_v27  ;;  %v727_v31 = vld [vmem:[%s2453_s1 + $0x48] sm:$0xff] (!%p193_p9)  ;;  %v728_v33 = vld [vmem:[%s2453_s1 + $0x50] sm:$0xff] (!%p193_p9)  ;;  %v729_v34 = vld [vmem:[%s2453_s1 + $0x58] sm:$0xff] (!%p193_p9)  ;;  %vm358_vm5 = vcmask (!%p193_p9), 1046528   ;;  %vm504_vm6 = vcmask (!%p193_p9), 1044480   ;;  %vm577_vm7 = vcmask (!%p193_p9), 1043456  }
  0x11   : > { %1482 = vmatprep.subr.bf16.mxu0 (!%p193_p9), %v1812_v20  ;;  %1513 = vmatprep.subr.bf16.mxu1 (!%p193_p9), %v1812_v20  ;;  %v1492_v32 = vpack.c.bf16 (!%p193_p9), %v727_v31, %v726_v30  ;;  %v1495_v35 = vpack.c.bf16 (!%p193_p9), %v729_v34, %v728_v33  ;;  %v730_v36 = vld [vmem:[%s2453_s1 + $0x60] sm:$0xff] (!%p193_p9)  ;;  %v731_v37 = vld [vmem:[%s2453_s1 + $0x68] sm:$0xff] (!%p193_p9)  ;;  %v732_v43 = vld [vmem:[%s2453_s1 + $0x70] sm:$0xff] (!%p193_p9)  ;;  %s1815_s17 = smov (!%p193_p9), 30   ;;  %s1816_s23 = smov (!%p193_p9), 90  }
  0x12   : > { %v1498_v38 = vpack.c.bf16 (!%p193_p9), %v731_v37, %v730_v36  ;;  %v733_v44 = vld [vmem:[%s2453_s1 + $0x78] sm:$0xff] (!%p193_p9)  ;;  %v734_v51 = vld [vmem:[%s2453_s1 + $0x80] sm:$0xff] (!%p193_p9)  ;;  %v735_v52 = vld [vmem:[%s2453_s1 + $0x88] sm:$0xff] (!%p193_p9)  ;;  %s1817_s25 = smov (!%p193_p9), 120   ;;  %s1459_s26 = sshll.u32 (!%p193_p9), %s1873_s22, 7 }
  0x13   : > { %v1501_v45 = vpack.c.bf16 (!%p193_p9), %v733_v44, %v732_v43  ;;  %v1504_v55 = vpack.c.bf16 (!%p193_p9), %v735_v52, %v734_v51  ;;  %s1821_s11 = smov (!%p193_p9), [#allocation2]  }
  0x14   : > { %1484 = vmatpush1.bf16.msra.mxu0 (!%p193_p9), %v1483_v23  ;;  %1523 = vmatpush1.bf16.msra.mxu1 (!%p193_p9), %v1483_v23  ;;  %s1751_s12 = sshll.u32 (!%p193_p9), %s1821_s11, 4  ;;  %s1752_s12 = int_to_ptr.vmem [resolvable:$false] %s1751_s12 }
  0x15   : > { %s2465_s30 = smov (!%p222_p10, %s1406_s30), 15  ;;  %1485 = vmatprep.subr.bf16.mxu0 %v1812_v20  ;;  %1514 = vmatprep.subr.bf16.mxu1 %v1812_v20  ;;  %s1753_s13 = scalar_lea.vmem %s1752_s12, 256 }
  0x16   : > { %s1462_s6 = sshll.u32 %s2465_s30, 4 }
  0x17   : > { %s226_s9 = scalar_lea.vmem %s2452_s0, %s1462_s6 }
  0x18   : > { %v230_v1 = vld [vmem:[%s226_s9 + $0x10] sm:$0xff]  ;;  %v228_v2 = vld [vmem:[%s226_s9] sm:$0xff]  ;;  %v231_v3 = vld [vmem:[%s226_s9 + $0x18] sm:$0xff]  ;;  %1487 = vmatpush1.bf16.msra.mxu0 %v1486_v26  ;;  %1524 = vmatpush1.bf16.msra.mxu1 %v1486_v26 }
  0x19   : > { %253 = vperm.xlu1 %1582, %v230_v1   ;;  %247 = vperm.xlu0 %1581, %v228_v2   ;;  %v229_v4 = vld [vmem:[%s226_s9 + $0x8] sm:$0xff]  ;;  %v239_v5 = vld [vmem:[%s226_s9 + $0x58] sm:$0xff]  ;;  %v238_v6 = vld [vmem:[%s226_s9 + $0x50] sm:$0xff] }
  0x1a   : > { %v233_v7 = vld [vmem:[%s226_s9 + $0x28] sm:$0xff]  ;;  %v232_v8 = vld [vmem:[%s226_s9 + $0x20] sm:$0xff]  ;;  %v234_v9 = vld [vmem:[%s226_s9 + $0x30] sm:$0xff]  ;;  %1488 = vmatprep.subr.bf16.mxu0 %v1812_v20  ;;  %1515 = vmatprep.subr.bf16.mxu1 %v1812_v20 }
  0x1b   : > { %v237_v10 = vld [vmem:[%s226_s9 + $0x48] sm:$0xff]  ;;  %v240_v11 = vld [vmem:[%s226_s9 + $0x60] sm:$0xff]  ;;  %v235_v12 = vld [vmem:[%s226_s9 + $0x38] sm:$0xff] }
  0x1c   : > { %v242_v13 = vld [vmem:[%s226_s9 + $0x70] sm:$0xff]  ;;  %v241_v14 = vld [vmem:[%s226_s9 + $0x68] sm:$0xff]  ;;  %v236_v15 = vld [vmem:[%s226_s9 + $0x40] sm:$0xff]  ;;  %1490 = vmatpush1.bf16.msra.mxu0 %v1489_v29  ;;  %1525 = vmatpush1.bf16.msra.mxu1 %v1489_v29 }
  0x1d   : > { %256 = vperm.xlu1 %1582, %v231_v3   ;;  %250 = vperm.xlu0 %1581, %v229_v4   ;;  %v243_v16 = vld [vmem:[%s226_s9 + $0x78] sm:$0xff]  ;;  %s2406_s9 = scalar_lea.hbm %s2457_s5, %s1459_s26 }
  0x1e   : > { %1491 = vmatprep.subr.bf16.mxu0 %v1812_v20  ;;  %1516 = vmatprep.subr.bf16.mxu1 %v1812_v20 }
  0x20   : > { %1493 = vmatpush1.bf16.msra.mxu0 %v1492_v32  ;;  %1526 = vmatpush1.bf16.msra.mxu1 %v1492_v32 }
  0x21   : > { %280 = vperm.xlu1 %1582, %v239_v5   ;;  %277 = vperm.xlu0 %1581, %v238_v6   ;;  %v736_v6 = vld [vmem:[%s2453_s1 + $0x90] sm:$0x3f] }
  0x22   : > { %1494 = vmatprep.subr.bf16.mxu0 %v1812_v20  ;;  %1517 = vmatprep.subr.bf16.mxu1 %v1812_v20 }
  0x24   : > { %1496 = vmatpush1.bf16.msra.mxu0 %v1495_v35  ;;  %1527 = vmatpush1.bf16.msra.mxu1 %v1495_v35 }
  0x25   : > { %262 = vperm.xlu1 %1582, %v233_v7   ;;  %259 = vperm.xlu0 %1581, %v232_v8  }
  0x26   : > { %1497 = vmatprep.subr.bf16.mxu0 %v1812_v20  ;;  %1518 = vmatprep.subr.bf16.mxu1 %v1812_v20 }
  0x28   : > { %1499 = vmatpush1.bf16.msra.mxu0 %v1498_v38  ;;  %1528 = vmatpush1.bf16.msra.mxu1 %v1498_v38 }
  0x29   : > { %265 = vperm.xlu1 %1582, %v234_v9   ;;  %274 = vperm.xlu0 %1581, %v237_v10  }
  0x2a   : > { %1500 = vmatprep.subr.bf16.mxu0 %v1812_v20  ;;  %1519 = vmatprep.subr.bf16.mxu1 %v1812_v20 }
  0x2c   : > { %1502 = vmatpush1.bf16.msra.mxu0 %v1501_v45  ;;  %1529 = vmatpush1.bf16.msra.mxu1 %v1501_v45 }
  0x2d   : > { %283 = vperm.xlu1 %1582, %v240_v11   ;;  %268 = vperm.xlu0 %1581, %v235_v12  }
  0x2e   : > { %1503 = vmatprep.subr.bf16.mxu0 %v1812_v20  ;;  %1520 = vmatprep.subr.bf16.mxu1 %v1812_v20 }
  0x30   : > { %1505 = vmatpush1.bf16.msra.mxu0 %v1504_v55  ;;  %1530 = vmatpush1.bf16.msra.mxu1 %v1504_v55 }
  0x31   : > { %289 = vperm.xlu1 %1582, %v242_v13   ;;  %286 = vperm.xlu0 %1581, %v241_v14  }
  0x32   : > { %890 = vmatprep.subr.mxu0 %v1813_v46  ;;  %1521 = vmatprep.subr.mxu1 %v1813_v46 }
  0x34   : > { %1442 = vmatpush1.msk.msra.mxu0 %vm431_vm4, %v736_v6  ;;  %1531 = vmatpush1.msk.msra.mxu1 %vm431_vm4, %v736_v6 }
  0x35   : > { %271 = vperm.xlu1 %1582, %v236_v15   ;;  %292 = vperm.xlu0 %1581, %v243_v16  }
  0x36   : > { %1506 = vmatprep.subr.bf16.mxu1 %v1812_v20 }
  0x98   : > { %v254_v41 = vpop.permute.xlu1 %253  ;;  %v248_v42 = vpop.permute.xlu0 %247 }
  0x99   : > { %vm294_vm0 = vcmp.eq.s32.totalorder %v248_v42, %v1962_v40  ;;  %vm296_vm1 = vcmp.eq.s32.totalorder %v254_v41, %v1962_v40 }
  0x9a   : > { %v1973_v47 = vsel %vm294_vm0, 1.0, %v1813_v46  ;;  %v1976_v50 = vsel %vm296_vm1, 1.0, %v1813_v46 }
  0x9b   : > { %v359_v56 = vrot.slane %v1973_v47, 1  ;;  %v432_v57 = vrot.slane %v1973_v47, 2  ;;  %v362_v60 = vrot.slane %v1976_v50, 1  ;;  %v505_v3 = vrot.slane %v1973_v47, 3 }
  0x9c   : > { %v257_v48 = vpop.permute.xlu1 %256  ;;  %v251_v49 = vpop.permute.xlu0 %250  ;;  %v435_v7 = vrot.slane %v1976_v50, 2  ;;  %v508_v10 = vrot.slane %v1976_v50, 3  ;;  %v581_v11 = vrot.slane %v1976_v50, 4  ;;  %v578_v16 = vrot.slane %v1973_v47, 4 }
  0x9d   : > { %vm297_vm2 = vcmp.eq.s32.totalorder %v257_v48, %v1962_v40  ;;  %vm295_vm3 = vcmp.eq.s32.totalorder %v251_v49, %v1962_v40 }
  0x9e   : > { %v1989_v53 = vsel %vm297_vm2, 1.0, %v1813_v46  ;;  %v1992_v54 = vsel %vm295_vm3, 1.0, %v1813_v46 }
  0x9f   : > { %v433_v58 = vrot.slane %v1992_v54, 2  ;;  %v360_v59 = vrot.slane %v1992_v54, 1  ;;  %v506_v63 = vrot.slane %v1992_v54, 3  ;;  %v363_v0 = vrot.slane %v1989_v53, 1 }
  0xa0   : > { %v281_v61 = vpop.permute.xlu1 %280  ;;  %v278_v62 = vpop.permute.xlu0 %277  ;;  %v579_v8 = vrot.slane %v1992_v54, 4  ;;  %v436_v9 = vrot.slane %v1989_v53, 2  ;;  %v582_v17 = vrot.slane %v1989_v53, 4  ;;  %v509_v21 = vrot.slane %v1989_v53, 3 }
  0xa1   : > { %v434_v1 = vsel %vm431_vm4, %v432_v57, %v433_v58  ;;  %v361_v2 = vsel %vm358_vm5, %v359_v56, %v360_v59  ;;  %v507_v14 = vsel %vm504_vm6, %v505_v3, %v506_v63  ;;  %v364_v15 = vsel %vm358_vm5, %v362_v60, %v363_v0 }
  0xa2   : > { %v1588_v4 = vpack.i.bf16 %v433_v58, %v434_v1  ;;  %v1583_v5 = vpack.i.bf16 %v360_v59, %v361_v2  ;;  %vm305_vm10 = vcmp.eq.s32.totalorder %v281_v61, %v1962_v40  ;;  %v1598_v18 = vpack.i.bf16 %v506_v63, %v507_v14 }
  0xa3   : > { %v1593_v19 = vpack.i.bf16 %v363_v0, %v364_v15  ;;  %vm304_vm11 = vcmp.eq.s32.totalorder %v278_v62, %v1962_v40  ;;  %v580_v23 = vsel %vm577_vm7, %v578_v16, %v579_v8  ;;  %v437_v24 = vsel %vm431_vm4, %v435_v7, %v436_v9 }
  0xa4   : > { %v263_v12 = vpop.permute.xlu1 %262  ;;  %1589 = vrot.lane.b32.xlu1 %v1588_v4, %s1814_s16  ;;  %1584 = vrot.lane.b32.xlu0 %v1583_v5, %s1815_s17  ;;  %v260_v13 = vpop.permute.xlu0 %259  ;;  %v2039_v27 = vsel %vm305_vm10, 1.0, %v1813_v46  ;;  %v2043_v28 = vsel %vm304_vm11, 1.0, %v1813_v46  ;;  %v1608_v30 = vpack.i.bf16 %v579_v8, %v580_v23  ;;  %v1603_v31 = vpack.i.bf16 %v436_v9, %v437_v24 }
  0xa5   : > { %vm299_vm8 = vcmp.eq.s32.totalorder %v263_v12, %v1962_v40  ;;  %vm298_vm9 = vcmp.eq.s32.totalorder %v260_v13, %v1962_v40  ;;  %v583_v34 = vsel %vm577_vm7, %v581_v11, %v582_v17  ;;  %v510_v35 = vsel %vm504_vm6, %v508_v10, %v509_v21 }
  0xa6   : > { %v2028_v22 = vsel %vm299_vm8, 1.0, %v1813_v46  ;;  %v2034_v25 = vsel %vm298_vm9, 1.0, %v1813_v46  ;;  %v374_v38 = vrot.slane %v2043_v28, 1  ;;  %v375_v39 = vrot.slane %v2039_v27, 1 }
  0xa7   : > { %v366_v29 = vrot.slane %v2028_v22, 1  ;;  %v365_v32 = vrot.slane %v2034_v25, 1  ;;  %v1618_v41 = vpack.i.bf16 %v582_v17, %v583_v34  ;;  %v1613_v42 = vpack.i.bf16 %v509_v21, %v510_v35 }
  0xa8   : > { %1599 = vrot.lane.b32.xlu1 %v1598_v18, %s1816_s23  ;;  %1594 = vrot.lane.b32.xlu0 %v1593_v19, %s1815_s17  ;;  %v275_v26 = vpop.permute.xlu0 %274  ;;  %v266_v36 = vpop.permute.xlu1 %265  ;;  %v439_v44 = vrot.slane %v2028_v22, 2  ;;  %v438_v45 = vrot.slane %v2034_v25, 2  ;;  %v447_v51 = vrot.slane %v2043_v28, 2  ;;  %v376_v52 = vsel %vm358_vm5, %v374_v38, %v375_v39 }
  0xa9   : > { %vm303_vm12 = vcmp.eq.s32.totalorder %v275_v26, %v1962_v40  ;;  %vm300_vm14 = vcmp.eq.s32.totalorder %v266_v36, %v1962_v40  ;;  %v367_v48 = vsel %vm358_vm5, %v365_v32, %v366_v29  ;;  %v448_v55 = vrot.slane %v2039_v27, 2 }
  0xaa   : > { %v2048_v33 = vsel %vm303_vm12, 1.0, %v1813_v46  ;;  %v2071_v56 = vsel %vm300_vm14, 1.0, %v1813_v46  ;;  %v1628_v58 = vpack.i.bf16 %v375_v39, %v367_v48  ;;  %v440_v62 = vsel %vm431_vm4, %v438_v45, %v439_v44 }
  0xab   : > { %v372_v43 = vrot.slane %v2048_v33, 1  ;;  %v445_v60 = vrot.slane %v2048_v33, 2  ;;  %v521_v63 = vrot.slane %v2039_v27, 3  ;;  %v520_v1 = vrot.slane %v2043_v28, 3 }
  0xac   : > { %1609 = vrot.lane.b32.xlu1 %v1608_v30, %s1817_s25  ;;  %1604 = vrot.lane.b32.xlu0 %v1603_v31, %s1814_s16  ;;  %v269_v37 = vpop.permute.xlu0 %268  ;;  %v284_v0 = vpop.permute.xlu1 %283  ;;  %v368_v2 = vrot.slane %v2071_v56, 1  ;;  %v449_v3 = vsel %vm431_vm4, %v447_v51, %v448_v55  ;;  %v1638_v4 = vpack.i.bf16 %v448_v55, %v440_v62  ;;  %v518_v6 = vrot.slane %v2048_v33, 3 }
  0xad   : > { %vm301_vm13 = vcmp.eq.s32.totalorder %v269_v37, %v1962_v40  ;;  %v1623_v59 = vpack.i.bf16 %v376_v52, %v372_v43  ;;  %v1633_v5 = vpack.i.bf16 %v449_v3, %v445_v60  ;;  %v512_v7 = vrot.slane %v2028_v22, 3 }
  0xae   : > { %v2063_v49 = vsel %vm301_vm13, 1.0, %v1813_v46  ;;  %v511_v8 = vrot.slane %v2034_v25, 3  ;;  %vm306_vm0 = vcmp.eq.s32.totalorder %v284_v0, %v1962_v40  ;;  %v594_v11 = vrot.slane %v2039_v27, 4 }
  0xaf   : > { %v369_v61 = vrot.slane %v2063_v49, 1  ;;  %v593_v12 = vrot.slane %v2043_v28, 4  ;;  %v522_v13 = vsel %vm504_vm6, %v520_v1, %v521_v63  ;;  %v2103_v14 = vsel %vm306_vm0, 1.0, %v1813_v46 }
  0xb0   : > { %1619 = vrot.lane.b32.xlu1 %v1618_v41, %s1817_s25  ;;  %1614 = vrot.lane.b32.xlu0 %v1613_v42, %s1816_s23  ;;  %v287_v57 = vpop.permute.xlu0 %286  ;;  %v1643_v15 = vpack.i.bf16 %v522_v13, %v518_v6  ;;  %v591_v17 = vrot.slane %v2048_v33, 4  ;;  %v442_v18 = vrot.slane %v2063_v49, 2  ;;  %v513_v21 = vsel %vm504_vm6, %v511_v8, %v512_v7  ;;  %v290_v23 = vpop.permute.xlu1 %289 }
  0xb1   : > { %vm307_vm15 = vcmp.eq.s32.totalorder %v287_v57, %v1962_v40  ;;  %v370_v9 = vsel %vm358_vm5, %v368_v2, %v369_v61  ;;  %v441_v24 = vrot.slane %v2071_v56, 2  ;;  %v377_v26 = vrot.slane %v2103_v14, 1 }
  0xb2   : > { %v2095_v10 = vsel %vm307_vm15, 1.0, %v1813_v46  ;;  %v1648_v16 = vpack.i.bf16 %v370_v9, %v366_v29  ;;  %v595_v30 = vsel %vm577_vm7, %v593_v12, %v594_v11  ;;  %v585_v29 = vrot.slane %v2028_v22, 4 }
  0xb3   : > { %v378_v19 = vrot.slane %v2095_v10, 1  ;;  %v1653_v31 = vpack.i.bf16 %v521_v63, %v513_v21  ;;  %v1658_v32 = vpack.i.bf16 %v595_v30, %v591_v17  ;;  %v584_v34 = vrot.slane %v2034_v25, 4 }
  0xb4   : > { %1629 = vrot.lane.b32.xlu1 %v1628_v58, %s1815_s17  ;;  %1624 = vrot.lane.b32.xlu0 %v1623_v59, %s1815_s17  ;;  %v451_v35 = vrot.slane %v2095_v10, 2  ;;  %v443_v36 = vsel %vm431_vm4, %v441_v24, %v442_v18  ;;  %v450_v38 = vrot.slane %v2103_v14, 2  ;;  %v272_v39 = vpop.permute.xlu1 %271  ;;  %v293_v41 = vpop.permute.xlu0 %292  ;;  %v524_v48 = vrot.slane %v2095_v10, 3 }
  0xb5   : > { %v379_v37 = vsel %vm358_vm5, %v377_v26, %v378_v19  ;;  %v1668_v42 = vpack.i.bf16 %v443_v36, %v439_v44  ;;  %v586_v52 = vsel %vm577_vm7, %v584_v34, %v585_v29  ;;  %v515_v55 = vrot.slane %v2063_v49, 3 }
  0xb6   : > { %v1663_v45 = vpack.i.bf16 %v379_v37, %v369_v61  ;;  %v452_v51 = vsel %vm431_vm4, %v450_v38, %v451_v35  ;;  %v514_v57 = vrot.slane %v2071_v56, 3  ;;  %v523_v58 = vrot.slane %v2103_v14, 3 }
  0xb7   : > { %vm302_vm1 = vcmp.eq.s32.totalorder %v272_v39, %v1962_v40  ;;  %vm309_vm2 = vcmp.eq.s32.totalorder %v293_v41, %v1962_v40  ;;  %vm308_vm3 = vcmp.eq.s32.totalorder %v290_v23, %v1962_v40  ;;  %v1678_v44 = vpack.i.bf16 %v452_v51, %v442_v18 }
  0xb8   : > { %1639 = vrot.lane.b32.xlu1 %v1638_v4, %s1814_s16  ;;  %1634 = vrot.lane.b32.xlu0 %v1633_v5, %s1814_s16  ;;  %v1673_v59 = vpack.i.bf16 %v594_v11, %v586_v52  ;;  %v597_v61 = vrot.slane %v2095_v10, 4  ;;  %v525_v62 = vsel %vm504_vm6, %v523_v58, %v524_v48  ;;  %v516_v63 = vsel %vm504_vm6, %v514_v57, %v515_v55 }
  0xb9   : > { %v588_v0 = vrot.slane %v2063_v49, 4  ;;  %v2146_v1 = vsel %vm302_vm1, 1.0, %v1813_v46  ;;  %v2149_v2 = vsel %vm309_vm2, 1.0, %v1813_v46  ;;  %v587_v40 = vrot.slane %v2071_v56, 4 }
  0xba   : > { %v596_v3 = vrot.slane %v2103_v14, 4  ;;  %v2156_v4 = vsel %vm308_vm3, 1.0, %v1813_v46  ;;  %v1688_v5 = vpack.i.bf16 %v525_v62, %v515_v55  ;;  %v1683_v8 = vpack.i.bf16 %v516_v63, %v512_v7 }
  0xbb   : > { %v371_v9 = vrot.slane %v2146_v1, 1  ;;  %v589_v12 = vsel %vm577_vm7, %v587_v40, %v588_v0  ;;  %v381_v13 = vrot.slane %v2149_v2, 1  ;;  %v444_v21 = vrot.slane %v2146_v1, 2 }
  0xbc   : > { %1644 = vrot.lane.b32.xlu0 %v1643_v15, %s1816_s23  ;;  %1649 = vrot.lane.b32.xlu1 %v1648_v16, %s1815_s17  ;;  %v598_v11 = vsel %vm577_vm7, %v596_v3, %v597_v61  ;;  %v380_v15 = vrot.slane %v2156_v4, 1  ;;  %v1693_v18 = vpack.i.bf16 %v589_v12, %v585_v29  ;;  %v454_v24 = vrot.slane %v2149_v2, 2 }
  0xbd   : > { %v1698_v16 = vpack.i.bf16 %v598_v11, %v588_v0  ;;  %v373_v7 = vsel %vm358_vm5, %v371_v9, %v372_v43  ;;  %v453_v26 = vrot.slane %v2156_v4, 2  ;;  %v446_v43 = vsel %vm431_vm4, %v444_v21, %v445_v60 }
  0xbe   : > { %v382_v23 = vsel %vm358_vm5, %v380_v15, %v381_v13  ;;  %v1708_v30 = vpack.i.bf16 %v381_v13, %v373_v7  ;;  %v527_v34 = vrot.slane %v2149_v2, 3  ;;  %v526_v36 = vrot.slane %v2156_v4, 3 }
  0xbf   : > { %v1703_v29 = vpack.i.bf16 %v382_v23, %v378_v19  ;;  %v1718_v37 = vpack.i.bf16 %v454_v24, %v446_v43  ;;  %v590_v19 = vrot.slane %v2146_v1, 4  ;;  %v600_v41 = vrot.slane %v2149_v2, 4 }
  0xc0   : > { %1654 = vrot.lane.b32.xlu0 %v1653_v31, %s1816_s23  ;;  %1659 = vrot.lane.b32.xlu1 %v1658_v32, %s1817_s25  ;;  %v517_v31 = vrot.slane %v2146_v1, 3  ;;  %v455_v32 = vsel %vm431_vm4, %v453_v26, %v454_v24  ;;  %v528_v60 = vsel %vm504_vm6, %v526_v36, %v527_v34  ;;  %vm650_vm4 = vcmask 244736  }
  0xc1   : > { %v1713_v38 = vpack.i.bf16 %v455_v32, %v451_v35  ;;  %v1723_v51 = vpack.i.bf16 %v528_v60, %v524_v48  ;;  %v592_v35 = vsel %vm577_vm7, %v590_v19, %v591_v17  ;;  %vm667_vm5 = vcmask 490496  }
  0xc2   : > { %v519_v39 = vsel %vm504_vm6, %v517_v31, %v518_v6  ;;  %v1738_v6 = vpack.i.bf16 %v600_v41, %v592_v35  ;;  %vm684_vm6 = vcmask 736256   ;;  %vm701_vm8 = vcmask 982016  }
  0xc3   : > { %vm1818_vm9 = vmmov 0   ;;  %vm1071_vm10 = vcmask 261120   ;;  %vm1073_vm11 = vcmask 257024   ;;  %vm1164_vm12 = vcmask 1041409  }
  0xc4   : > { %1669 = vrot.lane.b32.xlu1 %v1668_v42, %s1814_s16  ;;  %1664 = vrot.lane.b32.xlu0 %v1663_v45, %s1815_s17  ;;  %v599_v42 = vrot.slane %v2156_v4, 4  ;;  %v1728_v45 = vpack.i.bf16 %v527_v34, %v519_v39  ;;  %vm1166_vm13 = vcmask 1042434   ;;  %vm1168_vm14 = vcmask 1043459  }
  0xc5   : > { %vm1170_vm15 = vcmask 1044484   ;;  %vm1172_vm0 = vcmask 1045509   ;;  %vm1174_vm1 = vcmask 1046534   ;;  %vm1176_vm2 = vcmask 1047559  }
  0xc6   : > { %v601_v52 = vsel %vm577_vm7, %v599_v42, %v600_v41  ;;  %vm826_vm7 = vcmask 179200  }
  0xc7   : > { %v1733_v55 = vpack.i.bf16 %v601_v52, %v597_v61 }
  0xc8   : > { %1679 = vrot.lane.b32.xlu1 %v1678_v44, %s1814_s16  ;;  %1674 = vrot.lane.b32.xlu0 %v1673_v59, %s1817_s25 }
  0xcc   : > { %1689 = vrot.lane.b32.xlu1 %v1688_v5, %s1816_s23  ;;  %1684 = vrot.lane.b32.xlu0 %v1683_v8, %s1816_s23 }
  0xd0   : > { %1699 = vrot.lane.b32.xlu1 %v1698_v16, %s1817_s25  ;;  %1694 = vrot.lane.b32.xlu0 %v1693_v18, %s1817_s25 }
  0xd4   : > { %1709 = vrot.lane.b32.xlu1 %v1708_v30, %s1815_s17  ;;  %1704 = vrot.lane.b32.xlu0 %v1703_v29, %s1815_s17  ;;  %s1820_s17 = smov 96  }
  0xd8   : > { %1719 = vrot.lane.b32.xlu1 %v1718_v37, %s1814_s16  ;;  %1714 = vrot.lane.b32.xlu0 %v1713_v38, %s1814_s16  ;;  %s1819_s16 = smov 32  }
  0xdc   : > { %1729 = vrot.lane.b32.xlu1 %v1728_v45, %s1816_s23  ;;  %1724 = vrot.lane.b32.xlu0 %v1723_v51, %s1816_s23  ;;  %s218_s23 = sand.u32 1, %s1801_s19  }
  0xdd   : > { %s1329_s22 = scalar_lea.sflag [#allocation3], %s218_s23 }
  0xe0   : > { %1739 = vrot.lane.b32.xlu1 %v1738_v6, %s1817_s25  ;;  %1734 = vrot.lane.b32.xlu0 %v1733_v55, %s1817_s25  ;;  %s1405_s25 = sshll.u32 %s218_s23, 3 }
  0xe1   : > { %s220_s30 = scalar_lea.vmem [#allocation2], %s1405_s25 }
  0xe2   : > { %s1342_s6 = sshll.u32 %s220_s30, 4  ;;  %s2408_s6 = int_to_ptr.vmem [resolvable:$true] %s1342_s6 }
  0xe3   : > { %s1747_s10 = scalar_lea.vmem %s2408_s6, 128  ;;  %p1754_p0 = scmp.lt.s32.totalorder %s2408_s6, %s1752_s12 }
  0xe4   : > { %p1748_p11 = scmp.ne.s32.totalorder %s2408_s6, %s1747_s10  ;;  %p1755_p1 = scmp.lt.s32.totalorder %s1753_s13, %s1747_s10 }
  0xe6   : > { %p1749_p12 = pnand %p1748_p11, %p1890_p5  ;;  %p1756_p2 = por %p1755_p1, %p1754_p0 }
  0xe8   : > { %p1750_p13 = pneg %p1749_p12 }
  0xea   : > { %p1757_p3 = pnand %p1756_p2, %p1750_p13 }
 0x116   : > { %v1590_v57 = vpop.permute.xlu1 %1589  ;;  %v1585_v58 = vpop.permute.xlu0 %1584 }
 0x117   : > { %v1586_v44 = vunpack.i.l.bf16 %v1585_v58  ;;  %v1591_v62 = vunpack.i.l.bf16 %v1590_v57  ;;  %v1587_v0 = vunpack.i.h.bf16 %v1585_v58  ;;  %v1592_v15 = vunpack.i.h.bf16 %v1590_v57 }
 0x119   : > { %v651_v17 = vsel %vm650_vm4, %v1973_v47, %v1586_v44  ;;  %v652_v47 = vsel %vm650_vm4, %v1992_v54, %v1587_v0 }
 0x11a   : > { %v1600_v48 = vpop.permute.xlu1 %1599  ;;  %v1595_v59 = vpop.permute.xlu0 %1594  ;;  %v668_v9 = vsel %vm667_vm5, %v651_v17, %v1591_v62  ;;  %v669_v34 = vsel %vm667_vm5, %v652_v47, %v1592_v15 }
 0x11b   : > { %v1601_v63 = vunpack.i.l.bf16 %v1600_v48  ;;  %v1597_v40 = vunpack.i.h.bf16 %v1595_v59  ;;  %v1596_v61 = vunpack.i.l.bf16 %v1595_v59  ;;  %v1602_v18 = vunpack.i.h.bf16 %v1600_v48 }
 0x11d   : > { %v685_v13 = vsel %vm684_vm6, %v668_v9, %v1601_v63  ;;  %v654_v21 = vsel %vm650_vm4, %v1989_v53, %v1597_v40  ;;  %v653_v7 = vsel %vm650_vm4, %v1976_v50, %v1596_v61  ;;  %v686_v50 = vsel %vm684_vm6, %v669_v34, %v1602_v18 }
 0x11e   : > { %v1610_v3 = vpop.permute.xlu1 %1609  ;;  %v1605_v5 = vpop.permute.xlu0 %1604 }
 0x11f   : > { %v1611_v8 = vunpack.i.l.bf16 %v1610_v3  ;;  %v1607_v11 = vunpack.i.h.bf16 %v1605_v5  ;;  %v1606_v12 = vunpack.i.l.bf16 %v1605_v5  ;;  %v1612_v23 = vunpack.i.h.bf16 %v1610_v3 }
 0x121   : > { %1443 = vmatprep.mubr.msk.f32.mxu0 %vm826_vm7, %v1611_v8  ;;  %v702_v16 = vsel %vm701_vm8, %v685_v13, %v1611_v8  ;;  %v670_v54 = vsel %vm667_vm5, %v653_v7, %v1606_v12  ;;  %v671_v32 = vsel %vm667_vm5, %v654_v21, %v1607_v11  ;;  %v703_v41 = vsel %vm701_vm8, %v686_v50, %v1612_v23 }
 0x122   : > { %v1620_v24 = vpop.permute.xlu1 %1619  ;;  %v1615_v26 = vpop.permute.xlu0 %1614  ;;  %919 = vmatmul.mubr.f32.vlgmr.msra.gmra.mrb[0].mxu0 %v702_v16 }
 0x123   : > { %v1622_v30 = vunpack.i.h.bf16 %v1620_v24  ;;  %v1621_v29 = vunpack.i.l.bf16 %v1620_v24  ;;  %v1617_v31 = vunpack.i.h.bf16 %v1615_v26  ;;  %v1616_v43 = vunpack.i.l.bf16 %v1615_v26 }
 0x125   : > { %v687_v36 = vsel %vm684_vm6, %v670_v54, %v1616_v43  ;;  %v688_v53 = vsel %vm684_vm6, %v671_v32, %v1617_v31  ;;  %v1427_v37 = vcombine.low %v1612_v23, %v1621_v29 }
 0x126   : > { %v705_v38 = vsel %vm701_vm8, %v688_v53, %v1622_v30  ;;  %v1630_v19 = vpop.permute.xlu1 %1629  ;;  %v1625_v39 = vpop.permute.xlu0 %1624  ;;  %v704_v60 = vsel %vm701_vm8, %v687_v36, %v1621_v29 }
 0x127   : > { %1444 = vmatprep.mubr.msk.f32.mxu0 %vm826_vm7, %v1427_v37  ;;  %v1426_v42 = vcombine.low %v703_v41, %v704_v60  ;;  %v764_v45 = vcombine.low %v705_v38, %v1622_v30  ;;  %v763_v51 = vcombine.high %v704_v60, %v1621_v29  ;;  %v1627_v57 = vunpack.i.h.bf16 %v1625_v39 }
 0x128   : > { %v1626_v58 = vunpack.i.l.bf16 %v1625_v39  ;;  %v1632_v15 = vunpack.i.h.bf16 %v1630_v19  ;;  %v1631_v18 = vunpack.i.l.bf16 %v1630_v19 }
 0x129   : > { %924 = vmatmul.mubr.f32.gmra.mrb[2].mxu0 %v1426_v42  ;;  %v1429_v6 = vcombine.high %v1621_v29, %v764_v45  ;;  %v1428_v55 = vcombine.low %v763_v51, %v705_v38  ;;  %v661_v0 = vsel %vm650_vm4, %v2043_v28, %v1627_v57 }
 0x12a   : > { %v1640_v35 = vpop.permute.xlu1 %1639  ;;  %v1635_v52 = vpop.permute.xlu0 %1634  ;;  %v660_v40 = vsel %vm650_vm4, %v2048_v33, %v1626_v58  ;;  %v662_v29 = vsel %vm650_vm4, %v2039_v27, %v1632_v15  ;;  %v655_v31 = vsel %vm650_vm4, %v2034_v25, %v1631_v18 }
 0x12b   : > { %1445 = vmatprep.mubr.msk.f32.mxu0 %vm826_vm7, %v1429_v6  ;;  %v1637_v59 = vunpack.i.h.bf16 %v1635_v52  ;;  %v1636_v62 = vunpack.i.l.bf16 %v1635_v52  ;;  %v1642_v33 = vunpack.i.h.bf16 %v1640_v35  ;;  %v1641_v24 = vunpack.i.l.bf16 %v1640_v35 }
 0x12d   : > { %929 = vmatmul.mubr.f32.gmra.mrb[4].mxu0 %v1428_v55  ;;  %v677_v5 = vsel %vm667_vm5, %v660_v40, %v1636_v62  ;;  %v678_v8 = vsel %vm667_vm5, %v661_v0, %v1637_v59  ;;  %v679_v43 = vsel %vm667_vm5, %v662_v29, %v1642_v33  ;;  %v672_v37 = vsel %vm667_vm5, %v655_v31, %v1641_v24 }
 0x12e   : > { %v2225_v44 = vpop.permute.xlu1 %1649  ;;  %v1645_v48 = vpop.permute.xlu0 %1644 }
 0x12f   : > { %v1647_v17 = vunpack.i.h.bf16 %v1645_v48  ;;  %v1646_v63 = vunpack.i.l.bf16 %v1645_v48  ;;  %v1652_v34 = vunpack.i.h.bf16 %v2225_v44  ;;  %v1651_v50 = vunpack.i.l.bf16 %v2225_v44 }
 0x131   : > { %v694_v12 = vsel %vm684_vm6, %v677_v5, %v1646_v63  ;;  %v695_v13 = vsel %vm684_vm6, %v678_v8, %v1647_v17  ;;  %v657_v55 = vsel %vm650_vm4, %v2071_v56, %v1652_v34  ;;  %v656_v17 = vsel %vm650_vm4, %v2028_v22, %v1651_v50 }
 0x132   : > { %v1660_v61 = vpop.permute.xlu1 %1659  ;;  %v1655_v3 = vpop.permute.xlu0 %1654 }
 0x133   : > { %v1662_v9 = vunpack.i.h.bf16 %v1660_v61  ;;  %v1661_v11 = vunpack.i.l.bf16 %v1660_v61  ;;  %v1657_v26 = vunpack.i.h.bf16 %v1655_v3  ;;  %v1656_v30 = vunpack.i.l.bf16 %v1655_v3 }
 0x135   : > { %v1435_v47 = vcombine.low %v1661_v11, %v1662_v9  ;;  %v711_v16 = vsel %vm701_vm8, %v694_v12, %v1661_v11  ;;  %v712_v28 = vsel %vm701_vm8, %v695_v13, %v1662_v9  ;;  %v696_v38 = vsel %vm684_vm6, %v679_v43, %v1657_v26 }
 0x136   : > { %v1670_v21 = vpop.permute.xlu1 %1669  ;;  %v1665_v7 = vpop.permute.xlu0 %1664  ;;  %v1434_v23 = vcombine.low %v711_v16, %v712_v28  ;;  %v689_v27 = vsel %vm684_vm6, %v672_v37, %v1656_v30  ;;  %v775_v58 = vcombine.high %v712_v28, %v1662_v9 }
 0x137   : > { %1450 = vmatprep.mubr.msk.f32.mxu1 %vm826_vm7, %v1435_v47  ;;  %v1672_v19 = vunpack.i.h.bf16 %v1670_v21  ;;  %v1667_v39 = vunpack.i.h.bf16 %v1665_v7  ;;  %v1666_v60 = vunpack.i.l.bf16 %v1665_v7  ;;  %v1671_v42 = vunpack.i.l.bf16 %v1670_v21 }
 0x138   : > { %954 = vmatmul.mubr.f32.vlgmr.msra.gmra.mrb[0].mxu1 %v1434_v23 }
 0x139   : > { %v663_v63 = vsel %vm650_vm4, %v2103_v14, %v1667_v39  ;;  %v658_v0 = vsel %vm650_vm4, %v2063_v49, %v1666_v60  ;;  %v673_v61 = vsel %vm667_vm5, %v656_v17, %v1671_v42  ;;  %v674_v56 = vsel %vm667_vm5, %v657_v55, %v1672_v19 }
 0x13a   : > { %v1680_v54 = vpop.permute.xlu1 %1679  ;;  %v1675_v32 = vpop.permute.xlu0 %1674 }
 0x13b   : > { %v1677_v36 = vunpack.i.h.bf16 %v1675_v32  ;;  %v1676_v53 = vunpack.i.l.bf16 %v1675_v32  ;;  %v1682_v45 = vunpack.i.h.bf16 %v1680_v54  ;;  %v1681_v51 = vunpack.i.l.bf16 %v1680_v54 }
 0x13d   : > { %v713_v25 = vsel %vm701_vm8, %v696_v38, %v1677_v36  ;;  %1446 = vmatprep.mubr.msk.f32.mxu0 %vm826_vm7, %v1676_v53  ;;  %v706_v41 = vsel %vm701_vm8, %v689_v27, %v1676_v53  ;;  %v675_v3 = vsel %vm667_vm5, %v658_v0, %v1681_v51 }
 0x13e   : > { %v776_v35 = vcombine.low %v713_v25, %v1677_v36  ;;  %v1690_v52 = vpop.permute.xlu1 %1689  ;;  %v1685_v6 = vpop.permute.xlu0 %1684  ;;  %934 = vmatmul.mubr.f32.gmra.mrb[6].mxu0 %v706_v41  ;;  %v1436_v40 = vcombine.low %v775_v58, %v713_v25 }
 0x13f   : > { %v1692_v57 = vunpack.i.h.bf16 %v1690_v52  ;;  %v1691_v48 = vunpack.i.l.bf16 %v1690_v52  ;;  %v1687_v59 = vunpack.i.h.bf16 %v1685_v6  ;;  %v1686_v62 = vunpack.i.l.bf16 %v1685_v6 }
 0x140   : > { %v1437_v44 = vcombine.high %v1662_v9, %v776_v35  ;;  %v680_v9 = vsel %vm667_vm5, %v663_v63, %v1682_v45 }
 0x141   : > { %v692_v49 = vsel %vm684_vm6, %v675_v3, %v1691_v48  ;;  %v691_v13 = vsel %vm684_vm6, %v674_v56, %v1687_v59  ;;  %v690_v15 = vsel %vm684_vm6, %v673_v61, %v1686_v62  ;;  %v697_v47 = vsel %vm684_vm6, %v680_v9, %v1692_v57 }
 0x142   : > { %v1700_v5 = vpop.permute.xlu1 %1699  ;;  %v1695_v8 = vpop.permute.xlu0 %1694  ;;  %1451 = vmatprep.mubr.msk.f32.mxu1 %vm826_vm7, %v1437_v44 }
 0x143   : > { %v1702_v22 = vunpack.i.h.bf16 %v1700_v5  ;;  %v1701_v11 = vunpack.i.l.bf16 %v1700_v5  ;;  %v1697_v12 = vunpack.i.h.bf16 %v1695_v8  ;;  %v1696_v14 = vunpack.i.l.bf16 %v1695_v8  ;;  %959 = vmatmul.mubr.f32.gmra.mrb[2].mxu1 %v1436_v40 }
 0x145   : > { %v709_v16 = vsel %vm701_vm8, %v692_v49, %v1701_v11  ;;  %v1431_v28 = vcombine.low %v1696_v14, %v1697_v12  ;;  %1452 = vmatprep.mubr.msk.f32.mxu1 %vm826_vm7, %v1702_v22  ;;  %v714_v18 = vsel %vm701_vm8, %v697_v47, %v1702_v22  ;;  %v707_v33 = vsel %vm701_vm8, %v690_v15, %v1696_v14  ;;  %v1146_v14 = vld [vmem:[%s2455_s3 + $0x8] sm:$0xff]  ;;  %v1147_v49 = vld [vmem:[%s2455_s3 + $0x10] sm:$0xff]  ;;  %v1148_v15 = vld [vmem:[%s2455_s3 + $0x18] sm:$0xff] }
 0x146   : > { %v770_v21 = vcombine.low %v709_v16, %v1701_v11  ;;  %v1710_v7 = vpop.permute.xlu1 %1709  ;;  %v1705_v23 = vpop.permute.xlu0 %1704  ;;  %v708_v24 = vsel %vm701_vm8, %v691_v13, %v1697_v12  ;;  %v1510_v47 = vpack.c.bf16 %v1148_v15, %v1147_v49 }
 0x147   : > { %1447 = vmatprep.mubr.msk.f32.mxu0 %vm826_vm7, %v1431_v28  ;;  %964 = vmatmul.mubr.f32.gmra.mrb[4].mxu1 %v714_v18  ;;  %v1430_v26 = vcombine.low %v707_v33, %v708_v24  ;;  %v769_v29 = vcombine.high %v708_v24, %v1697_v12  ;;  %v1712_v32 = vunpack.i.h.bf16 %v1710_v7  ;;  %v1711_v34 = vunpack.i.l.bf16 %v1710_v7 }
 0x148   : > { %v1433_v30 = vcombine.high %v1697_v12, %v770_v21  ;;  %v1707_v36 = vunpack.i.h.bf16 %v1705_v23  ;;  %v1706_v53 = vunpack.i.l.bf16 %v1705_v23  ;;  %v1145_v12 = vld [vmem:[%s2455_s3] sm:$0xff] }
 0x149   : > { %939 = vmatmul.mubr.f32.gmra.mrb[8].mxu0 %v1430_v26  ;;  %v1432_v54 = vcombine.low %v769_v29, %v709_v16  ;;  %v666_v45 = vsel %vm650_vm4, %v2149_v2, %v1712_v32  ;;  %v659_v51 = vsel %vm650_vm4, %v2146_v1, %v1711_v34  ;;  %v1507_v13 = vpack.c.bf16 %v1146_v14, %v1145_v12  ;;  %v1425_v16 = vld [vmem:[%s2454_s2] ss:$0 sm:$0xff] }
 0x14a   : > { %v1720_v31 = vpop.permute.xlu1 %1719  ;;  %v1715_v43 = vpop.permute.xlu0 %1714  ;;  %1448 = vmatprep.mubr.msk.f32.mxu0 %vm826_vm7, %v1433_v30  ;;  %v665_v35 = vsel %vm650_vm4, %v2156_v4, %v1707_v36  ;;  %v664_v52 = vsel %vm650_vm4, %v2095_v10, %v1706_v53  ;;  %v783_v28 = vcombine.high %v1425_v16, %v1425_v16  ;;  %v2318_v26 = vcombine.low %v1425_v16, %v1425_v16 }
 0x14b   : > { %v1722_v37 = vunpack.i.h.bf16 %v1720_v31  ;;  %v1721_v50 = vunpack.i.l.bf16 %v1720_v31  ;;  %v1717_v38 = vunpack.i.h.bf16 %v1715_v43  ;;  %v1716_v19 = vunpack.i.l.bf16 %v1715_v43  ;;  %1508 = vmatpush3.bf16.msra.mxu1 %v1507_v13 }
 0x14c   : > { %1509 = vmatprep.subr.bf16.mxu1 %v1812_v20  ;;  %v2315_v18 = vcombine.low %v1425_v16, %v783_v28  ;;  %v2321_v43 = vcombine.low %v783_v28, %v1425_v16 }
 0x14d   : > { %944 = vmatmul.mubr.f32.gmra.mrb[10].mxu0 %v1432_v54  ;;  %v683_v6 = vsel %vm667_vm5, %v666_v45, %v1722_v37  ;;  %v681_v55 = vsel %vm667_vm5, %v664_v52, %v1716_v19  ;;  %v682_v57 = vsel %vm667_vm5, %v665_v35, %v1717_v38  ;;  %v676_v48 = vsel %vm667_vm5, %v659_v51, %v1721_v50 }
 0x14e   : > { %v1730_v27 = vpop.permute.xlu1 %1729  ;;  %v1725_v39 = vpop.permute.xlu0 %1724 }
 0x14f   : > { %v1732_v60 = vunpack.i.h.bf16 %v1730_v27  ;;  %v1731_v25 = vunpack.i.l.bf16 %v1730_v27  ;;  %v1727_v41 = vunpack.i.h.bf16 %v1725_v39  ;;  %v1726_v42 = vunpack.i.l.bf16 %v1725_v39  ;;  %1511 = vmatpush3.bf16.msra.mxu1 %v1510_v47 }
 0x151   : > { %v700_v17 = vsel %vm684_vm6, %v683_v6, %v1732_v60  ;;  %v698_v4 = vsel %vm684_vm6, %v681_v55, %v1726_v42  ;;  %v699_v10 = vsel %vm684_vm6, %v682_v57, %v1727_v41  ;;  %v693_v63 = vsel %vm684_vm6, %v676_v48, %v1731_v25 }
 0x152   : > { %v1740_v58 = vpop.permute.xlu1 %1739  ;;  %v1735_v44 = vpop.permute.xlu0 %1734 }
 0x153   : > { %v1742_v2 = vunpack.i.h.bf16 %v1740_v58  ;;  %v1741_v59 = vunpack.i.l.bf16 %v1740_v58  ;;  %v1737_v62 = vunpack.i.h.bf16 %v1735_v44  ;;  %v1736_v1 = vunpack.i.l.bf16 %v1735_v44 }
 0x155   : > { %v717_v0 = vsel %vm701_vm8, %v700_v17, %v1742_v2  ;;  %v1439_v40 = vcombine.low %v1736_v1, %v1737_v62  ;;  %1449 = vmatprep.mubr.msk.f32.mxu0 %vm826_vm7, %v1741_v59  ;;  %v710_v61 = vsel %vm701_vm8, %v693_v63, %v1741_v59  ;;  %v715_v56 = vsel %vm701_vm8, %v698_v4, %v1736_v1 }
 0x156   : > { %v782_v3 = vcombine.low %v717_v0, %v1742_v2  ;;  %949 = vmatmul.mubr.f32.gmra.mrb[12].mxu0 %v710_v61  ;;  %v716_v5 = vsel %vm701_vm8, %v699_v10, %v1737_v62 }
 0x157   : > { %1453 = vmatprep.mubr.msk.f32.mxu1 %vm826_vm7, %v1439_v40  ;;  %v1438_v8 = vcombine.low %v715_v56, %v716_v5  ;;  %v781_v9 = vcombine.high %v716_v5, %v1737_v62 }
 0x158   : > { %v1441_v22 = vcombine.high %v1737_v62, %v782_v3 }
 0x159   : > { %969 = vmatmul.mubr.f32.gmra.mrb[6].mxu1 %v1438_v8  ;;  %v1440_v11 = vcombine.low %v781_v9, %v717_v0 }
 0x15a   : > { %1454 = vmatprep.mubr.msk.f32.mxu1 %vm826_vm7, %v1441_v22 }
 0x15d   : > { %974 = vmatmul.mubr.f32.gmra.mrb[8].mxu1 %v1440_v11 }
 0x15e   : > { %1476 = vmatprep.mubr.msk.f32.mxu1 %vm1818_vm9, %v1813_v46 }
 0x1f5   : > { %v920_v33 = vpop.f32.mrb[0].mxu0 }
 0x1f6   : > { %v921_v21 = vadd.f32 %v920_v33, %v2315_v18  ;;  %v922_v7 = vpop.f32.mrb[1].mxu0 }
 0x1f8   : > { %v991_v23 = vcombine.high %v921_v21, %v921_v21  ;;  %v1015_v46 = vmax.f32 %v921_v21, 0.0 }
 0x1fa   : > { %v1016_v24 = vmax.f32 %v991_v23, 0.0 }
 0x1fc   : > { %v925_v30 = vpop.f32.mrb[2].mxu0  ;;  %v1055_v29 = vcombine.low %v1015_v46, %v1016_v24 }
 0x1fd   : > { %v926_v20 = vadd.f32 %v925_v30, %v2318_v26  ;;  %v927_v31 = vpop.f32.mrb[3].mxu0 }
 0x1fe   : > { %v1072_v36 = vsel %vm1071_vm10, %v1055_v29, -inf }
 0x1ff   : > { %v992_v54 = vcombine.high %v926_v20, %v926_v20  ;;  %v1017_v32 = vmax.f32 %v926_v20, 0.0 }
 0x200   : > { %v930_v34 = vpop.f32.mrb[4].mxu0 }
 0x201   : > { %v1074_v53 = vsel %vm1073_vm11, %v1017_v32, -inf  ;;  %v931_v37 = vadd.f32 %v930_v34, %v2321_v43  ;;  %v932_v50 = vpop.f32.mrb[5].mxu0  ;;  %v1018_v19 = vmax.f32 %v992_v54, 0.0 }
 0x202   : > { %v1075_v38 = vmax.f32 %v1072_v36, %v1074_v53 }
 0x203   : > { %v993_v27 = vcombine.high %v931_v37, %v931_v37  ;;  %v1019_v39 = vmax.f32 %v931_v37, 0.0 }
 0x204   : > { %v1076_v21 = vrot.slane %v1075_v38, 4 }
 0x205   : > { %v1020_v60 = vmax.f32 %v993_v27, 0.0  ;;  %v1056_v25 = vcombine.low %v1018_v19, %v1019_v39 }
 0x206   : > { %v1077_v54 = vmax.f32 %v1075_v38, %v1076_v21 }
 0x207   : > { %v1082_v41 = vsel %vm1071_vm10, %v1056_v25, -inf  ;;  %v1083_v42 = vsel %vm1073_vm11, %v1020_v60, -inf }
 0x208   : > { %v1084_v45 = vmax.f32 %v1082_v41, %v1083_v42  ;;  %v1078_v42 = vrot.slane %v1077_v54, 2 }
 0x20a   : > { %v1085_v30 = vrot.slane %v1084_v45, 4 }
 0x20b   : > { %v955_v51 = vpop.f32.mrb[0].mxu1 }
 0x20c   : > { %v957_v35 = vpop.f32.mrb[1].mxu1  ;;  %v2329_v52 = vadd.f32 %v955_v51, %v2318_v26  ;;  %v1086_v50 = vmax.f32 %v1084_v45, %v1085_v30 }
 0x20e   : > { %v998_v58 = vcombine.high %v2329_v52, %v2329_v52  ;;  %v1029_v38 = vmax.f32 %v2329_v52, 0.0 }
 0x210   : > { %v1030_v62 = vmax.f32 %v998_v58, 0.0 }
 0x211   : > { %v935_v6 = vpop.f32.mrb[6].mxu0 }
 0x212   : > { %v936_v55 = vadd.f32 %v935_v6, %v2315_v18  ;;  %v937_v57 = vpop.f32.mrb[7].mxu0 }
 0x214   : > { %v994_v44 = vcombine.high %v936_v55, %v936_v55  ;;  %v1021_v61 = vmax.f32 %v936_v55, 0.0 }
 0x216   : > { %v960_v48 = vpop.f32.mrb[2].mxu1  ;;  %v1022_v4 = vmax.f32 %v994_v44, 0.0  ;;  %v1087_v44 = vrot.slane %v1086_v50, 2 }
 0x217   : > { %v961_v2 = vadd.f32 %v960_v48, %v2321_v43  ;;  %v962_v59 = vpop.f32.mrb[3].mxu1 }
 0x218   : > { %v1057_v8 = vcombine.low %v1021_v61, %v1022_v4 }
 0x219   : > { %v999_v1 = vcombine.high %v961_v2, %v961_v2  ;;  %v1031_v17 = vmax.f32 %v961_v2, 0.0 }
 0x21a   : > { %v965_v10 = vpop.f32.mrb[4].mxu1  ;;  %v1091_v15 = vsel %vm1071_vm10, %v1057_v8, -inf }
 0x21b   : > { %v1032_v63 = vmax.f32 %v999_v1, 0.0  ;;  %v1060_v0 = vcombine.low %v1030_v62, %v1031_v17  ;;  %v967_v40 = vpop.f32.mrb[5].mxu1  ;;  %v966_v49 = vadd.f32 %v965_v10, %v2315_v18  ;;  %v1079_v10 = vmax.f32 %v1077_v54, %v1078_v42 }
 0x21c   : > { %v940_v5 = vpop.f32.mrb[8].mxu0 }
 0x21d   : > { %v1118_v56 = vsel %vm1071_vm10, %v1060_v0, -inf  ;;  %v1119_v3 = vsel %vm1073_vm11, %v1032_v63, -inf  ;;  %v941_v22 = vadd.f32 %v940_v5, %v2318_v26  ;;  %v942_v11 = vpop.f32.mrb[9].mxu0  ;;  %v1000_v46 = vcombine.high %v966_v49, %v966_v49 }
 0x21e   : > { %v1120_v9 = vmax.f32 %v1118_v56, %v1119_v3  ;;  %v1033_v60 = vmax.f32 %v966_v49, 0.0  ;;  %v1110_v63 = vsel %vm1073_vm11, %v1029_v38, -inf }
 0x21f   : > { %v995_v12 = vcombine.high %v941_v22, %v941_v22  ;;  %v1023_v14 = vmax.f32 %v941_v22, 0.0  ;;  %v1034_v36 = vmax.f32 %v1000_v46, 0.0 }
 0x220   : > { %v945_v13 = vpop.f32.mrb[10].mxu0  ;;  %v1121_v39 = vrot.slane %v1120_v9, 4 }
 0x221   : > { %v1092_v47 = vsel %vm1073_vm11, %v1023_v14, -inf  ;;  %v946_v16 = vadd.f32 %v945_v13, %v2321_v43  ;;  %v947_v28 = vpop.f32.mrb[11].mxu0  ;;  %v1024_v7 = vmax.f32 %v995_v12, 0.0  ;;  %v1061_v6 = vcombine.low %v1033_v60, %v1034_v36 }
 0x222   : > { %v1093_v33 = vmax.f32 %v1091_v15, %v1092_v47  ;;  %v1122_v2 = vmax.f32 %v1120_v9, %v1121_v39 }
 0x223   : > { %v996_v23 = vcombine.high %v946_v16, %v946_v16  ;;  %v1025_v24 = vmax.f32 %v946_v16, 0.0  ;;  %v1127_v52 = vsel %vm1071_vm10, %v1061_v6, -inf }
 0x224   : > { %v1094_v31 = vrot.slane %v1093_v33, 4  ;;  %v1123_v5 = vrot.slane %v1122_v2, 2 }
 0x225   : > { %v1026_v29 = vmax.f32 %v996_v23, 0.0  ;;  %v1058_v20 = vcombine.low %v1024_v7, %v1025_v24 }
 0x226   : > { %v1095_v25 = vmax.f32 %v1093_v33, %v1094_v31  ;;  %v1080_v33 = vrot.slane %v1079_v10, 1  ;;  %v1124_v21 = vmax.f32 %v1122_v2, %v1123_v5  ;;  %v1455_v2 = vld [vmem:[%s2456_s4] ss:$0 sm:$0xff] }
 0x227   : > { %v1100_v32 = vsel %vm1071_vm10, %v1058_v20, -inf  ;;  %v1101_v34 = vsel %vm1073_vm11, %v1026_v29, -inf }
 0x228   : > { %v1102_v53 = vmax.f32 %v1100_v32, %v1101_v34 }
 0x229   : > { %v950_v37 = vpop.f32.mrb[12].mxu0 }
 0x22a   : > { %v951_v19 = vadd.f32 %v950_v37, %v2315_v18  ;;  %v952_v27 = vpop.f32.mrb[13].mxu0  ;;  %v1103_v41 = vrot.slane %v1102_v53, 4  ;;  %v1096_v18 = vrot.slane %v1095_v25, 2  ;;  %v1125_v37 = vrot.slane %v1124_v21, 1 }
 0x22c   : > { %v997_v51 = vcombine.high %v951_v19, %v951_v19  ;;  %v970_v35 = vpop.f32.mrb[6].mxu1  ;;  %v1104_v55 = vmax.f32 %v1102_v53, %v1103_v41  ;;  %v1027_v48 = vmax.f32 %v951_v19, 0.0  ;;  %v1097_v8 = vmax.f32 %v1095_v25, %v1096_v18 }
 0x22d   : > { %v971_v57 = vadd.f32 %v970_v35, %v2318_v26  ;;  %v972_v58 = vpop.f32.mrb[7].mxu1  ;;  %v1088_v26 = vmax.f32 %v1086_v50, %v1087_v44  ;;  %v2358_v53 = vmax.f32 %v1079_v10, %v1080_v33 }
 0x22e   : > { %v1028_v45 = vmax.f32 %v997_v51, 0.0  ;;  %v1105_v59 = vrot.slane %v1104_v55, 2  ;;  %v1098_v7 = vrot.slane %v1097_v8, 1  ;;  %v2367_v51 = vmax.f32 %v1124_v21, %v1125_v37 }
 0x22f   : > { %v1035_v62 = vmax.f32 %v971_v57, 0.0  ;;  %v1001_v17 = vcombine.high %v971_v57, %v971_v57  ;;  %v1089_v15 = vrot.slane %v1088_v26, 1 }
 0x230   : > { %v1059_v1 = vcombine.low %v1027_v48, %v1028_v45  ;;  %v975_v4 = vpop.f32.mrb[8].mxu1  ;;  %v1106_v9 = vmax.f32 %v1104_v55, %v1105_v59  ;;  %v2356_v32 = vmax.f32 %v1097_v8, %v1098_v7 }
 0x231   : > { %v1128_v0 = vsel %vm1073_vm11, %v1035_v62, -inf  ;;  %v977_v40 = vpop.f32.mrb[9].mxu1  ;;  %v976_v3 = vadd.f32 %v975_v4, %v2321_v43  ;;  %v1036_v11 = vmax.f32 %v1001_v17, 0.0  ;;  %v2354_v31 = vmax.f32 %v1088_v26, %v1089_v15 }
 0x232   : > { %v1109_v61 = vsel %vm1071_vm10, %v1059_v1, -inf  ;;  %v1129_v56 = vmax.f32 %v1127_v52, %v1128_v0  ;;  %v1107_v24 = vrot.slane %v1106_v9, 1 }
 0x233   : > { %v1111_v22 = vmax.f32 %v1109_v61, %v1110_v63  ;;  %v1002_v14 = vcombine.high %v976_v3, %v976_v3  ;;  %v1037_v49 = vmax.f32 %v976_v3, 0.0  ;;  %v1165_v39 = vsel %vm1164_vm12, %v2354_v31, %v2358_v53 }
 0x234   : > { %v1130_v12 = vrot.slane %v1129_v56, 4  ;;  %v2360_v50 = vmax.f32 %v1106_v9, %v1107_v24  ;;  %v1167_v25 = vsel %vm1166_vm13, %v2356_v32, %v1165_v39 }
 0x235   : > { %v1112_v13 = vrot.slane %v1111_v22, 4  ;;  %v1038_v16 = vmax.f32 %v1002_v14, 0.0  ;;  %v1062_v28 = vcombine.low %v1036_v11, %v1037_v49 }
 0x236   : > { %v1131_v47 = vmax.f32 %v1129_v56, %v1130_v12  ;;  %v1169_v35 = vsel %vm1168_vm14, %v2360_v50, %v1167_v25 }
 0x237   : > { %v1113_v23 = vmax.f32 %v1111_v22, %v1112_v13  ;;  %v1136_v43 = vsel %vm1071_vm10, %v1062_v28, -inf  ;;  %v1137_v30 = vsel %vm1073_vm11, %v1038_v16, -inf }
 0x238   : > { %v1132_v46 = vrot.slane %v1131_v47, 2  ;;  %v1138_v20 = vmax.f32 %v1136_v43, %v1137_v30 }
 0x239   : > { %v1114_v29 = vrot.slane %v1113_v23, 2 }
 0x23a   : > { %v1133_v54 = vmax.f32 %v1131_v47, %v1132_v46  ;;  %v1139_v36 = vrot.slane %v1138_v20, 4 }
 0x23b   : > { %v1115_v34 = vmax.f32 %v1113_v23, %v1114_v29 }
 0x23c   : > { %v1140_v27 = vmax.f32 %v1138_v20, %v1139_v36  ;;  %v1134_v60 = vrot.slane %v1133_v54, 1 }
 0x23d   : > { %v1116_v19 = vrot.slane %v1115_v34, 1 }
 0x23e   : > { %v1141_v42 = vrot.slane %v1140_v27, 2  ;;  %v2372_v55 = vmax.f32 %v1133_v54, %v1134_v60 }
 0x23f   : > { %v1117_v41 = vmax.f32 %v1115_v34, %v1116_v19 }
 0x240   : > { %v1142_v38 = vmax.f32 %v1140_v27, %v1141_v42 }
 0x241   : > { %v1171_v6 = vsel %vm1170_vm15, %v1117_v41, %v1169_v35 }
 0x242   : > { %v1173_v57 = vsel %vm1172_vm0, %v2367_v51, %v1171_v6  ;;  %v1143_v58 = vrot.slane %v1142_v38, 1 }
 0x243   : > { %v1175_v44 = vsel %vm1174_vm1, %v2372_v55, %v1173_v57 }
 0x244   : > { %v2378_v48 = vmax.f32 %v1142_v38, %v1143_v58 }
 0x246   : > { %v1177_v45 = vsel %vm1176_vm2, %v2378_v48, %v1175_v44 }
 0x247   : > { %1477 = vmatmul.mubr.msk.f32.vlgmr.msra.gmra.mrb[10].mxu1 %vm1071_vm10, %v1177_v45 }
 0x31a   : > { %v1246_v18 = vpop.f32.mrb[10].mxu1 }
 0x31b   : > { %v1247_v59 = vadd.f32 %v1455_v2, %v1246_v18  ;;  %v1478_v62 = vpop.f32.mrb[11].mxu1 }
 0x31d   : > { %v1250_v1 = vmax.f32 %v1247_v59, 0.0  ;;  %v1457_v4 = vmul.f32 -1.442695, %v1247_v59 }
 0x31f   : > { %v1258_v17 = vsub.f32 %v1250_v1, %v1177_v45  ;;  %1743 = vpow2.f32 %v1457_v4 }
 0x321   : > { %1260 = vrot.lane.b32.xlu0 %v1258_v17, %s1819_s16 }
 0x329   : > { %v1744_v10 = vpop.eup %1743 }
 0x32a   : > { %v1254_v63 = vadd.f32 1.0, %v1744_v10 }
 0x32c   : > { %1745 = vrcp.f32 %v1254_v63 }
 0x336   : > { %v1746_v52 = vpop.eup %1745 }
 0x393   : > { %v1261_v0 = vpop.permute.xlu0 %1260 }
 0x394   : > { %v1263_v40 = vmul.f32 %v1746_v52, %v1261_v0 }
 0x396   : > { %1272 = vrot.lane.b32.xlu1 %v1263_v40, %s1820_s17  ;;  %v1266_v26 = vrot.slane %v1263_v40, 2  ;;  %v1265_v61 = vrot.slane %v1263_v40, 1  ;;  %v1267_v56 = vrot.slane %v1263_v40, 3  ;;  %v1268_v3 = vrot.slane %v1263_v40, 4 }
 0x397   : > { %v1269_v5 = vrot.slane %v1263_v40, 5  ;;  %v1270_v8 = vrot.slane %v1263_v40, 6  ;;  %v1271_v9 = vrot.slane %v1263_v40, 7 }
 0x398   : > { %1276 = vrot.lane.b32.xlu0 %v1266_v26, %s1820_s17 }
 0x39a   : > { %1274 = vrot.lane.b32.xlu1 %v1265_v61, %s1820_s17 }
 0x39c   : > { %1278 = vrot.lane.b32.xlu0 %v1267_v56, %s1820_s17 }
 0x39e   : > { %1280 = vrot.lane.b32.xlu1 %v1268_v3, %s1820_s17 }
 0x3a0   : > { %1282 = vrot.lane.b32.xlu0 %v1269_v5, %s1820_s17 }
 0x3a2   : > { %1284 = vrot.lane.b32.xlu1 %v1270_v8, %s1820_s17 }
 0x3a4   : > { %1286 = vrot.lane.b32.xlu0 %v1271_v9, %s1820_s17 }
 0x408   : > { %v1273_v22 = vpop.permute.xlu1 %1272 }
 0x409   : > { %v1296_v15 = vadd.f32 %v1273_v22, %v2358_v53 }
 0x40a   : > { %v1277_v11 = vpop.permute.xlu0 %1276 }
 0x40b   : > { %v1298_v12 = vadd.f32 %v1277_v11, %v2356_v32 }
 0x40c   : > { %v1275_v14 = vpop.permute.xlu1 %1274 }
 0x40d   : > { %v1297_v49 = vadd.f32 %v1275_v14, %v2354_v31  ;;  %v1314_v28 = vrot.slane %v1298_v12, 6 }
 0x40e   : > { %v1279_v13 = vpop.permute.xlu0 %1278 }
 0x40f   : > { %v1312_v47 = vrot.slane %v1297_v49, 7  ;;  %v1299_v16 = vadd.f32 %v1279_v13, %v2360_v50 }
 0x410   : > { %v1281_v33 = vpop.permute.xlu1 %1280 }
 0x411   : > { %v1313_v21 = vsel %vm1164_vm12, %v1312_v47, %v1296_v15  ;;  %v1316_v7 = vrot.slane %v1299_v16, 5  ;;  %v1300_v23 = vadd.f32 %v1281_v33, %v1117_v41 }
 0x412   : > { %v1315_v24 = vsel %vm1166_vm13, %v1314_v28, %v1313_v21  ;;  %v1283_v46 = vpop.permute.xlu0 %1282 }
 0x413   : > { %v1317_v43 = vsel %vm1168_vm14, %v1316_v7, %v1315_v24  ;;  %v1318_v30 = vrot.slane %v1300_v23, 4  ;;  %v1301_v29 = vadd.f32 %v1283_v46, %v2367_v51 }
 0x414   : > { %v1285_v20 = vpop.permute.xlu1 %1284 }
 0x415   : > { %v1319_v31 = vsel %vm1170_vm15, %v1318_v30, %v1317_v43  ;;  %v1320_v54 = vrot.slane %v1301_v29, 3  ;;  %v1302_v32 = vadd.f32 %v1285_v20, %v2372_v55 }
 0x416   : > { %v1287_v34 = vpop.permute.xlu0 %1286 }
 0x417   : > { %v1321_v36 = vsel %vm1172_vm0, %v1320_v54, %v1319_v31  ;;  %v1322_v53 = vrot.slane %v1302_v32, 2  ;;  %v1303_v37 = vadd.f32 %v1287_v34, %v2378_v48 }
 0x419   : > { %v1323_v50 = vsel %vm1174_vm1, %v1322_v53, %v1321_v36  ;;  %v1324_v19 = vrot.slane %v1303_v37, 1 }
 0x41b   : > { %v1325_v27 = vsel %vm1176_vm2, %v1324_v19, %v1323_v50 }
 0x41c   : > { %1327 = vst.msk [vmem:[%s220_s30] sm:$0xff] %vm1071_vm10, %v1325_v27 }
 0x41d   : > { %1760 = shalt.err (!%p1757_p3)
}
 0x41e   : > { %s1761_s14 = scalar_lea.hbm %s2406_s9, 128  ;;  %s1765_s17 = scalar_lea.hbm %s2457_s5, 256 }
 0x41f   : > { %p1762_p4 = scmp.ne.s32.totalorder %s2406_s9, %s1761_s14  ;;  %p1766_p9 = scmp.lt.u32.totalorder %s2406_s9, %s2457_s5 }
 0x420   : > { %p1767_p10 = scmp.lt.u32.totalorder %s1765_s17, %s1761_s14  ;;  %p1769_p12 = scmp.lt.u32.totalorder %s1761_s14, %s2406_s9 }
 0x421   : > { %p1763_p7 = pnand %p1762_p4, %p1890_p5 }
 0x422   : > { %p1768_p11 = por %p1767_p10, %p1766_p9 }
 0x423   : > { %p1764_p8 = pneg %p1763_p7 }
 0x424   : > { %p1770_p13 = por %p1769_p12, %p1768_p11 }
 0x426   : > { %p1771_p0 = pnand %p1770_p13, %p1764_p8 }
 0x428   : > { %1774 = shalt.err (!%p1771_p0)
}
 0x429   : > { %1532 = dma.vmem_to_hbm [thread:$0]  (%p1890_p5), %s2408_s6, 128, %s2406_s9, %s1329_s22  }
 0x42a PF: > { %p1538_p1 = scmp.ge.s32.totalorder %s1809_s21, 2  ;;  %s1354_s26 = sand.u32 1, %s1797_s18  }
 0x42b   : > { %s1355_s30 = scalar_lea.sflag [#allocation3], %s1354_s26 }
 0x42c   : > { %p1535_p2 = pnand %p1538_p1, %p1894_p6 }
 0x42e   : > { %1792 = dma.done.wait (!%p1535_p2), %s1355_s30, 128  }
 0x42f   : > { %1794 = vsyncadd (!%p1535_p2), %s1355_s30, 4294967168  ;;  %p15_p3 = scmp.ge.s32.totalorder %s1877_s24, 4   ;;  %s2460_s18 = smov %s1801_s19 }
 0x430   : > { %s2461_s19 = smov %s1805_s20  ;;  %s2462_s20 = smov %s1888_s27 }
 0x431   : > { %s2463_s21 = smov %s1877_s24  ;;  %17 = sbr.rel (!%p15_p3) target bundleno = 3 (0x3), region = 75 }
 0x438   :  { %1360 = vsyncpa [#allocation3], 1 }
 0x439   :  { %1362 = vsyncpa [#allocation3 + $0x1], 1 }

</bundles_post_ra>
